<compile_context>
chip_gen: v7x
topology: tpu7x:2x2x1
jax: 0.10.0
libtpu: 0.0.40
codegen_flags: <defaults>
</compile_context>

<pallas_src>
import functools
import numpy as np
import jax
import jax.numpy as jnp
from jax.experimental import pallas as pl
from jax.experimental.pallas import tpu as pltpu

_LANES = 128
_SUBLANES = 8
_VMEM_BUDGET = 10 * 1024 * 1024   # single-copy sum of block bytes per grid step
_VMEM_LIMIT = 40 * 1024 * 1024    # scoped VMEM limit (covers 2x buffering + slack,
                                  # still well under v7x's 64 MiB physical VMEM)


def _round_up(n, m):
    return ((n + m - 1) // m) * m


def _pick_rows(G, bytes_per_row, budget=_VMEM_BUDGET, want_two_steps=True):
    """Largest row tile R (multiple of 8, dividing G) whose block fits `budget`.

    Keeps the grid length >= 2 when possible so v7x's two TensorCores both get
    work on the "parallel" axis.
    """
    r_cap = max(_SUBLANES, (budget // max(bytes_per_row, 1)) // _SUBLANES * _SUBLANES)
    r_cap = min(r_cap, G)
    if want_two_steps and G >= 2 * _SUBLANES:
        r_cap = min(r_cap, (G // 2) // _SUBLANES * _SUBLANES)
    r = max(_SUBLANES, r_cap)
    while r > _SUBLANES and G % r != 0:
        r -= _SUBLANES
    return r


def _pad_tf(x2d):
    """(T, F) -> dense (T, G, 128) view, zero-padding F up to whole (8,128) tiles."""
    T, F = x2d.shape
    G = _round_up((F + _LANES - 1) // _LANES, _SUBLANES)
    Fp = G * _LANES
    if Fp != F:
        x2d = jnp.pad(x2d, ((0, 0), (0, Fp - F)))
    return x2d.reshape(T, G, _LANES), G, Fp


# ------------- fused magnitude-score (L2 over T) + EMA kernel -----------------
def _scores_ema_kernel(alpha_ref, x_ref, prev_ref, out_ref):
    x = x_ref[...].astype(jnp.float32)             # (T, R, 128) dense block
    s = jnp.sqrt(jnp.sum(x * x, axis=0))           # (R, 128)
    alpha = alpha_ref[0]
    out_ref[...] = alpha * prev_ref[...] + (1.0 - alpha) * s


def magnitude_scores_ema(x3d, prev2d, alpha):
    T, G, L = x3d.shape
    bytes_per_row = (T + 2) * L * 4                # x rows + prev + out
    R = _pick_rows(G, bytes_per_row)
    return pl.pallas_call(
        _scores_ema_kernel,
        out_shape=jax.ShapeDtypeStruct((G, L), jnp.float32),
        grid=(G // R,),
        in_specs=[
            pl.BlockSpec(memory_space=pltpu.MemorySpace.SMEM),   # alpha scalar
            pl.BlockSpec((T, R, L), lambda i: (0, i, 0)),        # x (T, G, 128)
            pl.BlockSpec((R, L), lambda i: (i, 0)),              # previous EMA
        ],
        out_specs=pl.BlockSpec((R, L), lambda i: (i, 0)),
        compiler_params=pltpu.CompilerParams(
            dimension_semantics=("parallel",),
            vmem_limit_bytes=_VMEM_LIMIT),
    )(jnp.asarray([alpha], jnp.float32), x3d, prev2d)


# --------------------------- IF recurrence kernel -----------------------------
def _if_kernel(T, thre_ref, x_ref, mask_ref, out_ref):
    thre = thre_ref[0]
    thre_masked = thre * mask_ref[...]             # hoisted out of the T loop
    mem = jnp.zeros(mask_ref.shape, jnp.float32) + 0.5 * thre
    # TODO(synk): for large T (>~16) stream T on a trailing "arbitrary" grid axis
    # with the membrane held in VMEM scratch instead of keeping (T, R, 128) resident.
    for t in range(T):                             # T is small & static -> unrolled
        mem = mem + x_ref[t].astype(jnp.float32)   # (R, 128) dense slice
        spike = jnp.where(mem >= thre, thre_masked, 0.0)   # ZIF fwd * thresh * mask
        mem = mem - spike
        out_ref[t] = spike.astype(out_ref.dtype)


def if_forward(x3d, mask2d, thresh):
    T, G, L = x3d.shape
    bytes_per_row = (2 * T + 1) * L * 4            # x block + out block + mask block
    R = _pick_rows(G, bytes_per_row)
    kernel = functools.partial(_if_kernel, T)
    return pl.pallas_call(
        kernel,
        out_shape=jax.ShapeDtypeStruct((T, G, L), x3d.dtype),
        grid=(G // R,),
        in_specs=[
            pl.BlockSpec(memory_space=pltpu.MemorySpace.SMEM),   # thresh scalar
            pl.BlockSpec((T, R, L), lambda i: (0, i, 0)),        # x (T, G, 128)
            pl.BlockSpec((R, L), lambda i: (i, 0)),              # pruning mask
        ],
        out_specs=pl.BlockSpec((T, R, L), lambda i: (0, i, 0)),
        compiler_params=pltpu.CompilerParams(
            dimension_semantics=("parallel",),
            vmem_limit_bytes=_VMEM_LIMIT),
    )(thresh.astype(jnp.float32), x3d, mask2d)


# ------------------------------ QCFS kernel (T==0) -----------------------------
def _qcfs_kernel(L, inv_L, thre_ref, x_ref, out_ref):
    thre = thre_ref[0]
    inv_thre = 1.0 / thre                          # exact scalar reciprocal (not approx)
    x = x_ref[...].astype(jnp.float32) * inv_thre
    x = jnp.clip(x, 0.0, 1.0)
    x = jnp.floor(x * L + 0.5) * inv_L
    out_ref[...] = (x * thre).astype(out_ref.dtype)


def qcfs_forward(x, thresh, L):
    orig_shape = x.shape
    total = int(np.prod(orig_shape))
    G = _round_up((total + _LANES - 1) // _LANES, _SUBLANES)
    padded = G * _LANES
    flat = x.reshape(-1)
    if padded != total:
        flat = jnp.pad(flat, (0, padded - total))
    x2 = flat.reshape(G, _LANES)                   # lane-major 2-D view, tiled over rows
    bytes_per_row = 2 * _LANES * 4                 # in + out
    R = _pick_rows(G, bytes_per_row)
    kernel = functools.partial(_qcfs_kernel, float(L), 1.0 / float(L))
    out = pl.pallas_call(
        kernel,
        out_shape=jax.ShapeDtypeStruct((G, _LANES), x.dtype),
        grid=(G // R,),
        in_specs=[
            pl.BlockSpec(memory_space=pltpu.MemorySpace.SMEM),
            pl.BlockSpec((R, _LANES), lambda i: (i, 0)),
        ],
        out_specs=pl.BlockSpec((R, _LANES), lambda i: (i, 0)),
        compiler_params=pltpu.CompilerParams(
            dimension_semantics=("parallel",),
            vmem_limit_bytes=_VMEM_LIMIT),
    )(thresh.astype(jnp.float32), x2)
    out_flat = out.reshape(padded)
    if padded != total:
        out_flat = out_flat[:total]
    return out_flat.reshape(orig_shape)


# ------------------------------ module port ------------------------------------
class ProgressivePruningIF:
    """Forward-only JAX/Pallas port of the PyTorch ProgressivePruningIF layer."""

    def __init__(self, T=0, L=8, thresh=8.0, tau=1.0, gama=1.0,
                 initial_pruning_ratio=0.0, final_pruning_ratio=0.3,
                 pruning_schedule_steps=1000):
        self.thresh = jnp.array([thresh], dtype=jnp.float32)
        self.tau = tau
        self.gama = gama            # only used by the ZIF backward (not ported)
        self.L = L
        self.T = T
        self.loss = 0
        self.initial_pruning_ratio = initial_pruning_ratio
        self.final_pruning_ratio = final_pruning_ratio
        self.pruning_schedule_steps = pruning_schedule_steps
        self.current_step = 0
        self.magnitude_scores = None   # (F,) view, matches PyTorch semantics
        self.prune_mask = None
        self._scores_padded = None     # internal padded (G, 128) EMA state

    def get_current_pruning_ratio(self):
        progress = min(self.current_step / self.pruning_schedule_steps, 1.0)
        return (self.initial_pruning_ratio
                + (self.final_pruning_ratio - self.initial_pruning_ratio)
                * (1 - np.cos(np.pi * progress)) / 2)

    def update_magnitude_scores(self, x3d, F):
        T, G, L = x3d.shape
        if self._scores_padded is None or self._scores_padded.shape[0] != G:
            prev = jnp.zeros((G, L), jnp.float32)
            alpha = 0.0                             # first call: scores = current
        else:
            prev = self._scores_padded
            alpha = 0.9
        self._scores_padded = magnitude_scores_ema(x3d, prev, alpha)
        self.magnitude_scores = self._scores_padded.reshape(-1)[:F]

    def update_pruning_mask(self):
        ratio = self.get_current_pruning_ratio()
        if ratio > 0 and self.magnitude_scores is not None:
            # TODO(synk): torch.quantile (sort + linear interpolation) kept in plain JAX.
            thr = jnp.quantile(self.magnitude_scores, ratio)
            self.prune_mask = (self.magnitude_scores > thr).astype(jnp.float32)

    def __call__(self, x):
        self.current_step += 1
        if self.T > 0:
            TB = x.shape[0]
            B = TB // self.T
            F = B * int(np.prod(x.shape[1:]))
            x2d = x.reshape(self.T, F)              # == ExpandTemporalDim + view(T, -1)
            x3d, G, Fp = _pad_tf(x2d)
            self.update_magnitude_scores(x3d, F)
            self.update_pruning_mask()
            if self.prune_mask is not None:
                # The original module multiplies a (B*C*H*W,) mask against (B, C*H*W);
                # that broadcast only holds for B == 1 (faithful to the PyTorch code).
                assert B == 1, "pruning-mask broadcast requires B == 1 (as in the PyTorch code)"
                mask = self.prune_mask
            else:
                mask = jnp.ones((F,), jnp.float32)
            if Fp != F:
                mask = jnp.pad(mask, (0, Fp - F))
            mask2d = mask.reshape(G, _LANES)
            out3d = if_forward(x3d, mask2d, self.thresh)     # Pallas IF recurrence
            out2d = out3d.reshape(self.T, Fp)[:, :F]
            return out2d.reshape(x.shape)                    # == stack + MergeTemporalDim
        else:
            return qcfs_forward(x, self.thresh, self.L)


# ------------------------------ references -------------------------------------
def _ref_if(x, thresh, T, mask):
    thre = thresh[0]
    B = x.shape[0] // T
    xe = x.reshape((T, B) + x.shape[1:])
    mem = 0.5 * thre
    outs = []
    for t in range(T):
        mem = mem + xe[t]
        spike = jnp.where(mem - thre >= 0, thre, 0.0)
        if mask is not None:
            spike = (spike.reshape(B, -1) * mask.reshape(1, -1)).reshape(spike.shape)
        mem = mem - spike
        outs.append(spike)
    return jnp.stack(outs, 0).reshape(x.shape)


def _ref_scores(x, T):
    x2 = x.reshape(T, -1)
    return jnp.sqrt(jnp.sum(x2 * x2, axis=0))


def _ref_qcfs(x, thresh, L):
    thre = thresh[0]
    xx = jnp.clip(x / thre, 0.0, 1.0)
    return jnp.floor(xx * L + 0.5) / L * thre


if __name__ == "__main__":
    key = jax.random.PRNGKey(0)
    k1, k2, k3 = jax.random.split(key, 3)

    # ---- SNN path (T > 0): IF recurrence + progressive pruning, F % 128 == 0 ----
    T, B, C, H, W = 4, 1, 4, 16, 16
    x = jax.random.normal(k1, (T * B, C, H, W), dtype=jnp.float32) * 4.0
    layer = ProgressivePruningIF(T=T, L=8, thresh=8.0)
    y = layer(x)
    jax.block_until_ready(y)
    assert y.shape == x.shape
    assert jnp.allclose(layer.magnitude_scores, _ref_scores(x, T), atol=1e-4), "scores mismatch"
    y_ref = _ref_if(x, layer.thresh, T, layer.prune_mask)
    assert jnp.allclose(y, y_ref, atol=1e-5), "SNN path mismatch"

    # ---- SNN path with F NOT a multiple of 128 (exercises the padding path) ----
    T2, C2, H2, W2 = 4, 3, 10, 10
    x2 = jax.random.normal(k2, (T2, C2, H2, W2), dtype=jnp.float32) * 4.0
    layer2 = ProgressivePruningIF(T=T2, L=8, thresh=8.0)
    y2 = layer2(x2)
    jax.block_until_ready(y2)
    y2_ref = _ref_if(x2, layer2.thresh, T2, layer2.prune_mask)
    assert jnp.allclose(y2, y2_ref, atol=1e-5), "SNN padded path mismatch"

    # ---- ANN / QCFS path (T == 0) ----
    x3 = jax.random.normal(k3, (2, 4, 16, 16), dtype=jnp.float32) * 4.0
    layer0 = ProgressivePruningIF(T=0, L=8, thresh=8.0)
    y0 = layer0(x3)
    jax.block_until_ready(y0)
    y0_ref = _ref_qcfs(x3, layer0.thresh, 8)
    assert jnp.allclose(y0, y0_ref, atol=1e-5), "QCFS path mismatch"

    print("KERNEL_OK")
</pallas_src>

<mosaic_0001>
module attributes {stable_mosaic.version = 11 : i64} {
  func.func @_scores_ema_kernel(%arg0: i32, %arg1: memref<1xf32, #tpu.memory_space<smem>>, %arg2: memref<4x8x128xf32, #tpu.memory_space<vmem>>, %arg3: memref<8x128xf32, #tpu.memory_space<vmem>>, %arg4: memref<8x128xf32, #tpu.memory_space<vmem>>) attributes {dimension_semantics = [#tpu.dimension_semantics<parallel>], iteration_bounds = array<i64: 1>, scalar_prefetch = 0 : i64, scratch_operands = 0 : i64, tpu.core_type = #tpu.core_type<tc>, window_params = [{transform_indices = @transform_0, window_bounds = array<i64: 1>}, {transform_indices = @transform_1, window_bounds = array<i64: 4, 8, 128>}, {transform_indices = @transform_2, window_bounds = array<i64: 8, 128>}, {transform_indices = @transform_3, window_bounds = array<i64: 8, 128>}]} {
    %c0 = arith.constant 0 : index
    %c0_0 = arith.constant 0 : index
    %c0_1 = arith.constant 0 : index
    %0 = vector.load %arg2[%c0, %c0_0, %c0_1] : memref<4x8x128xf32, #tpu.memory_space<vmem>>, vector<4x8x128xf32>
    %1 = arith.mulf %0, %0 : vector<4x8x128xf32>
    %cst = arith.constant dense<0.000000e+00> : vector<8x128xf32>
    %2 = vector.multi_reduction <add>, %1, %cst [0] : vector<4x8x128xf32> to vector<8x128xf32>
    %3 = math.sqrt %2 : vector<8x128xf32>
    %c0_2 = arith.constant 0 : index
    %4 = memref.load %arg1[%c0_2] : memref<1xf32, #tpu.memory_space<smem>>
    %c0_3 = arith.constant 0 : index
    %c0_4 = arith.constant 0 : index
    %5 = vector.load %arg3[%c0_3, %c0_4] : memref<8x128xf32, #tpu.memory_space<vmem>>, vector<8x128xf32>
    %6 = vector.broadcast %4 : f32 to vector<8x128xf32>
    %7 = arith.mulf %6, %5 : vector<8x128xf32>
    %cst_5 = arith.constant 1.000000e+00 : f32
    %8 = arith.subf %cst_5, %4 : f32
    %9 = vector.broadcast %8 : f32 to vector<8x128xf32>
    %10 = arith.mulf %9, %3 : vector<8x128xf32>
    %11 = arith.addf %7, %10 : vector<8x128xf32>
    %c0_6 = arith.constant 0 : index
    %c0_7 = arith.constant 0 : index
    %12 = vector.load %arg4[%c0_6, %c0_7] : memref<8x128xf32, #tpu.memory_space<vmem>>, vector<8x128xf32>
    tpu.vector_store %arg4[%c0_6, %c0_7], %11 {strides = array<i32>} : memref<8x128xf32, #tpu.memory_space<vmem>>, vector<8x128xf32>,
    return
  }
  func.func @transform_0(%arg0: i32) -> i32 {
    %c0_i32 = arith.constant 0 : i32
    %c0_i32_0 = arith.constant 0 : i32
    return %c0_i32 : i32
  }
  func.func @transform_1(%arg0: i32) -> (i32, i32, i32) {
    %c0_i32 = arith.constant 0 : i32
    %c0_i32_0 = arith.constant 0 : i32
    %c0_i32_1 = arith.constant 0 : i32
    return %c0_i32, %arg0, %c0_i32_0 : i32, i32, i32
  }
  func.func @transform_2(%arg0: i32) -> (i32, i32) {
    %c0_i32 = arith.constant 0 : i32
    %c0_i32_0 = arith.constant 0 : i32
    return %arg0, %c0_i32 : i32, i32
  }
  func.func @transform_3(%arg0: i32) -> (i32, i32) {
    %c0_i32 = arith.constant 0 : i32
    %c0_i32_0 = arith.constant 0 : i32
    return %arg0, %c0_i32 : i32, i32
  }
}

</mosaic_0001>

<bundles_post_ra>
// kernel: tpu_custom_call.1
= control target key start
LH: loop header
LB: loop body
LE: loop exit
PB: predicated region body
PF: predicated region fallthrough
CT: control target
= control target key end

     0   :  { %9 = vsyncpa [#allocation4], 0  ;;  %s231_s0 = inlined_call_operand.<no memory space> [shape: f32[1], index: 0, kind: input, shape index: {}]   ;;  %s232_s1 = inlined_call_operand.hbm [shape: f32[4,8,128], index: 1, kind: input, shape index: {}]   ;;  %s233_s2 = inlined_call_operand.hbm [shape: f32[8,128], index: 2, kind: input, shape index: {}]   ;;  %s234_s3 = inlined_call_operand.hbm [shape: f32[8,128], index: 3, kind: output, shape index: {}]  }
   0x1   :  { %10 = vsyncpa [#allocation7], 0 }
   0x2   :  { %11 = vsyncpa [#allocation5], 0  ;;  %s164_s12 = smov [#allocation3]   ;;  %s92_s16 = scalar_lea.hbm %s232_s1, 512 }
   0x3   :  { %s19_s13 = sshll.u32 %s164_s12, 4  ;;  %p93_p0 = scmp.ne.s32.totalorder %s232_s1, %s92_s16  ;;  %s20_s13 = int_to_ptr.vmem [resolvable:$true] %s19_s13 }
   0x4   :  { %p96_p1 = scmp.lt.u32.totalorder %s92_s16, %s232_s1 }
   0x6   :  { %p98_p2 = pnand %p96_p1, %p93_p0 }
   0x8   :  { %101 = shalt.err (!%p98_p2)
}
   0x9   :  { %s102_s21 = scalar_lea.vmem %s20_s13, 512  ;;  %p107_p4 = scmp.lt.s32.totalorder %s20_s13, %s20_s13 }
   0xa   :  { %p103_p3 = scmp.ne.s32.totalorder %s20_s13, %s102_s21  ;;  %p108_p5 = scmp.lt.s32.totalorder %s102_s21, %s102_s21 }
   0xc   :  { %p109_p6 = por %p108_p5, %p107_p4 }
   0xe   :  { %p110_p7 = pnand %p109_p6, %p103_p3 }
  0x10   :  { %113 = shalt.err (!%p110_p7)
}
  0x11   :  { %s165_s22 = smov 128   ;;  %s166_s23 = smov 8  }
  0x12   :  { %25 = dma.hbm_to_vmem [thread:$0]  %s232_s1, 512, %s20_s13, [#allocation4], %s165_s22, %s165_s22, %s166_s23  }
  0x13   :  { %s167_s26 = smov [#allocation6]   ;;  %s114_s30 = scalar_lea.hbm %s233_s2, 128 }
  0x14   :  { %s32_s27 = sshll.u32 %s167_s26, 4  ;;  %p115_p8 = scmp.ne.s32.totalorder %s233_s2, %s114_s30  ;;  %s33_s27 = int_to_ptr.vmem [resolvable:$true] %s32_s27 }
  0x15   :  { %p118_p9 = scmp.lt.u32.totalorder %s114_s30, %s233_s2 }
  0x17   :  { %p120_p10 = pnand %p118_p9, %p115_p8 }
  0x19   :  { %123 = shalt.err (!%p120_p10)
}
  0x1a   :  { %s124_s8 = scalar_lea.vmem %s33_s27, 128  ;;  %p129_p12 = scmp.lt.s32.totalorder %s33_s27, %s33_s27 }
  0x1b   :  { %p125_p11 = scmp.ne.s32.totalorder %s33_s27, %s124_s8  ;;  %p130_p13 = scmp.lt.s32.totalorder %s124_s8, %s124_s8 }
  0x1d   :  { %p131_p0 = por %p130_p13, %p129_p12 }
  0x1f   :  { %p132_p1 = pnand %p131_p0, %p125_p11 }
  0x21   :  { %135 = shalt.err (!%p132_p1)
}
  0x22   :  { %35 = dma.hbm_to_vmem [thread:$0]  %s233_s2, 128, %s33_s27, [#allocation7]  }
  0x23   :  { %158 = dma.done.wait [#allocation4], 512  }
  0x24   :  { %159 = vsyncadd [#allocation4], 4294966784 }
  0x25   :  { %160 = dma.done.wait [#allocation7], 128  }
  0x26   :  { %161 = vsyncadd [#allocation7], 4294967168  ;;  %v42_v0 = vld [vmem:[#allocation3] sm:$0xff]  ;;  %v43_v1 = vld [vmem:[#allocation3 + $0x8] sm:$0xff]  ;;  %s64_s2 = ssub.f32 1.0, %s231_s0  ;;  %v62_v14 = vstv %s231_s0  ;;  %s168_s14 = smov [#allocation8]  }
  0x27   :  { %v44_v2 = vld [vmem:[#allocation3 + $0x10] sm:$0xff]  ;;  %v45_v3 = vld [vmem:[#allocation3 + $0x18] sm:$0xff]  ;;  %v46_v4 = vmul.f32 %v42_v0, %v42_v0  ;;  %v47_v5 = vmul.f32 %v43_v1, %v43_v1  ;;  %v61_v13 = vld [vmem:[#allocation6] sm:$0xff]  ;;  %s75_s15 = sshll.u32 %s168_s14, 4  ;;  %s76_s15 = int_to_ptr.vmem [resolvable:$true] %s75_s15 }
  0x28   :  { %v48_v6 = vmul.f32 %v44_v2, %v44_v2  ;;  %v49_v7 = vmul.f32 %v45_v3, %v45_v3  ;;  %v65_v16 = vstv %s64_s2  ;;  %v63_v18 = vmul.f32 %v62_v14, %v61_v13  ;;  %s136_s16 = scalar_lea.vmem %s76_s15, 128  ;;  %p141_p3 = scmp.lt.s32.totalorder %s76_s15, %s76_s15 }
  0x29   :  { %v50_v8 = vadd.f32 %v47_v5, %v46_v4  ;;  %p137_p2 = scmp.ne.s32.totalorder %s76_s15, %s136_s16  ;;  %p142_p4 = scmp.lt.s32.totalorder %s136_s16, %s136_s16 }
  0x2b   :  { %v51_v9 = vadd.f32 %v50_v8, %v48_v6  ;;  %p143_p5 = por %p142_p4, %p141_p3 }
  0x2d   :  { %v52_v10 = vadd.f32 %v51_v9, %v49_v7  ;;  %p144_p6 = pnand %p143_p5, %p137_p2 }
  0x2f   :  { %90 = vrsqrt.f32 %v52_v10  ;;  %vm55_vm0 = vcmp.eq.f32.partialorder %v52_v10, inf  ;;  %v58_v12 = vand.u32 2147483648, %v52_v10  ;;  %vm57_vm1 = vcmp.eq.f32.partialorder %v52_v10, 0.0 }
  0x39   :  { %v91_v11 = vpop.eup %90 }
  0x3a   :  { %v54_v15 = vmul.f32 %v91_v11, %v52_v10 }
  0x3c   :  { %v56_v17 = vsel %vm55_vm0, %v52_v10, %v54_v15 }
  0x3d   :  { %v59_v19 = vsel %vm57_vm1, %v58_v12, %v56_v17 }
  0x3e   :  { %v66_v20 = vmul.f32 %v65_v16, %v59_v19 }
  0x40   :  { %v67_v21 = vadd.f32 %v66_v20, %v63_v18 }
  0x42   :  { %68 = vst [vmem:[#allocation8] sm:$0xff] %v67_v21 }
  0x43   :  { %147 = shalt.err (!%p144_p6)
}
  0x44   :  { %s148_s18 = scalar_lea.hbm %s234_s3, 128 }
  0x45   :  { %p149_p7 = scmp.ne.s32.totalorder %s234_s3, %s148_s18  ;;  %p152_p8 = scmp.lt.u32.totalorder %s148_s18, %s234_s3 }
  0x47   :  { %p154_p9 = pnand %p152_p8, %p149_p7 }
  0x49   :  { %157 = shalt.err (!%p154_p9)
}
  0x4a   :  { %78 = dma.vmem_to_hbm [thread:$0]  %s76_s15, 128, %s234_s3, [#allocation5]  }
  0x4b   :  { %162 = dma.done.wait [#allocation5], 128  }
  0x4c   :  { %163 = vsyncadd [#allocation5], 4294967168 }
  0x4d   :  { %82 = vsyncpa [#allocation4], 1 }
  0x4e   :  { %83 = vsyncpa [#allocation7], 1 }
  0x4f   :  { %84 = vsyncpa [#allocation5], 1 }

</bundles_post_ra>
